<compile_context>
chip_gen: v7x
topology: tpu7x:2x2x1
jax: 0.10.0
libtpu: 0.0.40
codegen_flags: <defaults>
</compile_context>

<pallas_src>
import functools
import math

import jax
import jax.numpy as jnp
from jax.experimental import pallas as pl
from jax.experimental.pallas import tpu as pltpu


def _round_up(x, m):
    return ((x + m - 1) // m) * m


def _choose_row_tile(h_out, min_pitch, max_lanes=2048):
    """Pick (output rows per tile, padded row pitch).

    Returns the largest divisor `th` of h_out with th * pitch <= max_lanes,
    where pitch >= min_pitch is rounded up so that th * pitch is a multiple of
    128 (lane-dense, aligned output stores)."""
    best_th, best_pitch = 1, _round_up(min_pitch, 128)
    for th in range(1, h_out + 1):
        if h_out % th:
            continue
        step = 128 // math.gcd(th, 128)
        pitch = _round_up(min_pitch, step)
        if th * pitch <= max_lanes:
            best_th, best_pitch = th, pitch
    return best_th, best_pitch


def _conv_bn_lrelu_kernel(x_ref, w_ref, b_ref, o_ref, *,
                          k_s, pitch, m_tile, negative_slope):
    """One grid step = one (image, output-row-tile) pair.

    x_ref: (1, 1, cin_p, lwin)      input row window, spatial dims flattened
                                    into lanes with row pitch `pitch`
    w_ref: (cout, k_s*k_s*cin_p)    conv weights with BN scale folded in
    b_ref: (cout, 1)                folded BN bias (f32)
    o_ref: (1, cout, m_tile)        m_tile = tile_rows * pitch (multiple of 128)
    """
    f = x_ref[0, 0]                                    # (cin_p, lwin)
    # im2col: each (kh, kw) tap is a static lane-shifted view of the same
    # flattened window; stack along the contraction axis -> ONE matmul.
    taps = [f[:, kh * pitch + kw: kh * pitch + kw + m_tile]
            for kh in range(k_s) for kw in range(k_s)]
    patches = jnp.concatenate(taps, axis=0)            # (k_s*k_s*cin_p, m_tile)
    acc = jnp.dot(w_ref[...], patches,
                  preferred_element_type=jnp.float32)  # (cout, m_tile) f32
    y = acc + b_ref[...]                               # folded BN bias
    o_ref[0] = jnp.where(y > 0, y, negative_slope * y).astype(o_ref.dtype)


def conv_bn_lrelu(x_nchw, weight, gamma, beta, running_mean, running_var, *,
                  k_s=3, stride=1, pad=1, eps=1e-5, negative_slope=0.1,
                  tile_rows=None, compute_dtype=jnp.bfloat16):
    """Fused Conv2d(bias=False) + eval-mode BatchNorm2d + LeakyReLU(0.1).

    x_nchw: (N, Cin, H, W) f32; weight: (Cout, Cin, k, k) (PyTorch layouts).
    Returns (N, Cout, Hout, Wout) f32 (matches the PyTorch module output).
    """
    if stride != 1:
        # TODO(synk): stride > 1 needs a strided output-lane mapping; only the
        # module's default stride=1 path is implemented.
        raise NotImplementedError("only stride=1 is supported")

    n, cin, h, w = x_nchw.shape
    cout = weight.shape[0]
    h_out = h + 2 * pad - k_s + 1
    w_out = w + 2 * pad - k_s + 1
    hp, wp = h + 2 * pad, w + 2 * pad

    # Row tiling: `th` output rows per grid step; the row pitch is padded so
    # the flattened per-tile lane count (m_tile) is a multiple of 128.
    if tile_rows is None:
        th, pitch = _choose_row_tile(h_out, wp)
    else:
        th = int(tile_rows)
        assert h_out % th == 0, "tile_rows must divide the output height"
        pitch = _round_up(wp, 128 // math.gcd(th, 128))
    n_rt = h_out // th
    m_tile = th * pitch
    row_span = th + k_s - 1                      # input rows per tile (w/ halo)
    lwin = row_span * pitch + (k_s - 1)          # flattened window length

    # Pad channels to a sublane-tile multiple so the in-kernel concatenation of
    # the taps happens at tile-aligned offsets.
    sub = 32 // jnp.dtype(compute_dtype).itemsize      # 8 for f32, 16 for bf16
    cin_p = _round_up(cin, sub)

    # ---- glue (cheap plain JAX; no NCHW<->NHWC transposes) -----------------
    x_c = x_nchw.astype(compute_dtype)
    x_pad = jnp.pad(x_c, ((0, 0), (0, cin_p - cin),
                          (pad, pad), (pad, pad + pitch - wp)))
    x_flat = jnp.pad(x_pad.reshape(n, cin_p, hp * pitch),
                     ((0, 0), (0, 0), (0, k_s - 1)))
    # Overlapping row windows (k_s-1 halo rows) -> purely blocked BlockSpec,
    # no data-dependent / dynamic indexing in the kernel.
    x_win = jnp.stack(
        [x_flat[:, :, r * th * pitch: r * th * pitch + lwin]
         for r in range(n_rt)], axis=1)                # (N, n_rt, cin_p, lwin)

    # Fold eval-mode BN into per-output-channel scale/bias; fold the scale
    # straight into the conv weights so the kernel epilogue is add-only.
    inv_std = jax.lax.rsqrt(running_var.astype(jnp.float32) + eps)
    scale = gamma.astype(jnp.float32) * inv_std                       # (Cout,)
    bias = beta.astype(jnp.float32) - running_mean.astype(jnp.float32) * scale
    w_f = weight.astype(jnp.float32) * scale[:, None, None, None]
    w_t = jnp.transpose(w_f, (0, 2, 3, 1))                   # (Cout,kh,kw,Cin)
    w_t = jnp.pad(w_t, ((0, 0), (0, 0), (0, 0), (0, cin_p - cin)))
    w2 = w_t.reshape(cout, k_s * k_s * cin_p).astype(compute_dtype)
    b2 = bias.reshape(cout, 1)                                        # f32

    kernel = functools.partial(_conv_bn_lrelu_kernel, k_s=k_s, pitch=pitch,
                               m_tile=m_tile, negative_slope=negative_slope)

    out_flat = pl.pallas_call(
        kernel,
        out_shape=jax.ShapeDtypeStruct((n, cout, n_rt * m_tile), jnp.float32),
        grid_spec=pltpu.PrefetchScalarGridSpec(
            num_scalar_prefetch=0,
            grid=(n, n_rt),
            in_specs=[
                pl.BlockSpec((1, 1, cin_p, lwin), lambda b, r: (b, r, 0, 0)),
                pl.BlockSpec((cout, k_s * k_s * cin_p), lambda b, r: (0, 0)),
                pl.BlockSpec((cout, 1), lambda b, r: (0, 0)),
            ],
            out_specs=pl.BlockSpec((1, cout, m_tile), lambda b, r: (b, 0, r)),
        ),
        # Both grid axes are independent -> megacore / v7x dual-TC sharding.
        # TODO(synk): for very large layers on v7x (64 MiB VMEM) shrink
        # max_lanes in _choose_row_tile / set vmem_limit_bytes explicitly.
        compiler_params=pltpu.CompilerParams(
            dimension_semantics=("parallel", "parallel")),
    )(x_win, w2, b2)

    # Un-flatten rows and strip the (pitch - w_out) junk columns per row.
    out = out_flat.reshape(n, cout, h_out, pitch)[:, :, :, :w_out]
    return out


def _reference(x_nchw, weight, gamma, beta, running_mean, running_var,
               *, stride=1, pad=1, eps=1e-5, negative_slope=0.1):
    y = jax.lax.conv_general_dilated(
        x_nchw, weight, window_strides=(stride, stride),
        padding=((pad, pad), (pad, pad)),
        dimension_numbers=("NCHW", "OIHW", "NCHW"))
    inv_std = jax.lax.rsqrt(running_var + eps)
    y = (y - running_mean[None, :, None, None]) * inv_std[None, :, None, None]
    y = y * gamma[None, :, None, None] + beta[None, :, None, None]
    return jnp.where(y > 0, y, negative_slope * y)


if __name__ == "__main__":
    key = jax.random.PRNGKey(0)
    k_x, k_w, k_g, k_b, k_m, k_v = jax.random.split(key, 6)

    N, IN_C, OUT_C, H, W = 2, 4, 8, 16, 16

    x = jax.random.normal(k_x, (N, IN_C, H, W), dtype=jnp.float32)
    # Deterministic synthetic parameters (shapes per nn.Conv2d / nn.BatchNorm2d).
    weight = jax.random.normal(k_w, (OUT_C, IN_C, 3, 3), dtype=jnp.float32) * 0.1
    gamma = 1.0 + 0.1 * jax.random.normal(k_g, (OUT_C,), dtype=jnp.float32)
    beta = 0.1 * jax.random.normal(k_b, (OUT_C,), dtype=jnp.float32)
    running_mean = 0.1 * jax.random.normal(k_m, (OUT_C,), dtype=jnp.float32)
    running_var = 1.0 + 0.1 * jax.random.uniform(k_v, (OUT_C,), dtype=jnp.float32)

    ref = _reference(x, weight, gamma, beta, running_mean, running_var)

    # f32 MXU path, explicit 2-row-tile grid (exercises the tiled path); tight check.
    out_f32 = conv_bn_lrelu(x, weight, gamma, beta, running_mean, running_var,
                            compute_dtype=jnp.float32, tile_rows=8)
    out_f32 = jax.block_until_ready(out_f32)
    assert out_f32.shape == (N, OUT_C, H, W), out_f32.shape
    assert jnp.allclose(out_f32, ref, atol=1e-3, rtol=1e-3), \
        float(jnp.max(jnp.abs(out_f32 - ref)))

    # Default bf16 MXU path (v6e/v7x recommendation), auto row-tiling; loose check.
    out_bf16 = conv_bn_lrelu(x, weight, gamma, beta, running_mean, running_var)
    out_bf16 = jax.block_until_ready(out_bf16)
    assert out_bf16.shape == (N, OUT_C, H, W), out_bf16.shape
    assert jnp.allclose(out_bf16, ref, atol=6e-2, rtol=6e-2), \
        float(jnp.max(jnp.abs(out_bf16 - ref)))

    print("KERNEL_OK")
</pallas_src>

<mosaic_0001>
module attributes {stable_mosaic.version = 11 : i64} {
  func.func @_conv_bn_lrelu_kernel(%arg0: i32, %arg1: i32, %arg2: memref<1x1x8x322xf32, #tpu.memory_space<vmem>>, %arg3: memref<8x72xf32, #tpu.memory_space<vmem>>, %arg4: memref<8x1xf32, #tpu.memory_space<vmem>>, %arg5: memref<1x8x256xf32, #tpu.memory_space<vmem>>) attributes {dimension_semantics = [#tpu.dimension_semantics<parallel>, #tpu.dimension_semantics<parallel>], iteration_bounds = array<i64: 2, 2>, scalar_prefetch = 0 : i64, scratch_operands = 0 : i64, tpu.core_type = #tpu.core_type<tc>, window_params = [{transform_indices = @transform_0, window_bounds = array<i64: 1, 1, 8, 322>}, {pipeline_mode = #tpu.pipeline_mode<synchronous>, transform_indices = @transform_1, window_bounds = array<i64: 8, 72>}, {pipeline_mode = #tpu.pipeline_mode<synchronous>, transform_indices = @transform_2, window_bounds = array<i64: 8, 1>}, {transform_indices = @transform_3, window_bounds = array<i64: 1, 8, 256>}]} {
    %c0 = arith.constant 0 : index
    %c0_0 = arith.constant 0 : index
    %c0_1 = arith.constant 0 : index
    %c0_2 = arith.constant 0 : index
    %0 = vector.load %arg2[%c0, %c0_0, %c0_1, %c0_2] : memref<1x1x8x322xf32, #tpu.memory_space<vmem>>, vector<1x1x8x322xf32>
    %1 = vector.shape_cast %0 : vector<1x1x8x322xf32> to vector<8x322xf32>
    %2 = vector.extract_strided_slice %1 {offsets = [0, 0], sizes = [8, 256], strides = [1, 1]} : vector<8x322xf32> to vector<8x256xf32>
    %3 = vector.extract_strided_slice %1 {offsets = [0, 1], sizes = [8, 256], strides = [1, 1]} : vector<8x322xf32> to vector<8x256xf32>
    %4 = vector.extract_strided_slice %1 {offsets = [0, 2], sizes = [8, 256], strides = [1, 1]} : vector<8x322xf32> to vector<8x256xf32>
    %5 = vector.extract_strided_slice %1 {offsets = [0, 32], sizes = [8, 256], strides = [1, 1]} : vector<8x322xf32> to vector<8x256xf32>
    %6 = vector.extract_strided_slice %1 {offsets = [0, 33], sizes = [8, 256], strides = [1, 1]} : vector<8x322xf32> to vector<8x256xf32>
    %7 = vector.extract_strided_slice %1 {offsets = [0, 34], sizes = [8, 256], strides = [1, 1]} : vector<8x322xf32> to vector<8x256xf32>
    %8 = vector.extract_strided_slice %1 {offsets = [0, 64], sizes = [8, 256], strides = [1, 1]} : vector<8x322xf32> to vector<8x256xf32>
    %9 = vector.extract_strided_slice %1 {offsets = [0, 65], sizes = [8, 256], strides = [1, 1]} : vector<8x322xf32> to vector<8x256xf32>
    %10 = vector.extract_strided_slice %1 {offsets = [0, 66], sizes = [8, 256], strides = [1, 1]} : vector<8x322xf32> to vector<8x256xf32>
    %11 = tpu.concatenate %2, %3, %4, %5, %6, %7, %8, %9, %10 in 0 : vector<8x256xf32>, vector<8x256xf32>, vector<8x256xf32>, vector<8x256xf32>, vector<8x256xf32>, vector<8x256xf32>, vector<8x256xf32>, vector<8x256xf32>, vector<8x256xf32> -> vector<72x256xf32>
    %c0_3 = arith.constant 0 : index
    %c0_4 = arith.constant 0 : index
    %12 = vector.load %arg3[%c0_3, %c0_4] : memref<8x72xf32, #tpu.memory_space<vmem>>, vector<8x72xf32>
    %cst = arith.constant dense<0.000000e+00> : vector<8x256xf32>
    %13 = tpu.matmul %12, %11, %cst {dimension_numbers = #tpu.dot_dimension_numbers<[1], [0], [0], [1], [0, 0, 1, 1], [], []>} : vector<8x72xf32>, vector<72x256xf32>, vector<8x256xf32> -> vector<8x256xf32>
    %c0_5 = arith.constant 0 : index
    %c0_6 = arith.constant 0 : index
    %14 = vector.load %arg4[%c0_5, %c0_6] : memref<8x1xf32, #tpu.memory_space<vmem>>, vector<8x1xf32>
    %15 = vector.broadcast %14 : vector<8x1xf32> to vector<8x256xf32>
    %16 = arith.addf %13, %15 : vector<8x256xf32>
    %cst_7 = arith.constant 0.000000e+00 : f32
    %17 = vector.broadcast %cst_7 : f32 to vector<8x256xf32>
    %18 = arith.cmpf ogt, %16, %17 : vector<8x256xf32>
    %cst_8 = arith.constant 1.000000e-01 : f32
    %19 = vector.broadcast %cst_8 : f32 to vector<8x256xf32>
    %20 = arith.mulf %19, %16 : vector<8x256xf32>
    %21 = arith.select %18, %16, %20 : vector<8x256xi1>, vector<8x256xf32>
    %c0_9 = arith.constant 0 : index
    %c0_10 = arith.constant 0 : index
    %c0_11 = arith.constant 0 : index
    %22 = vector.load %arg5[%c0_9, %c0_10, %c0_11] : memref<1x8x256xf32, #tpu.memory_space<vmem>>, vector<1x8x256xf32>
    %23 = vector.shape_cast %22 : vector<1x8x256xf32> to vector<8x256xf32>
    %24 = vector.shape_cast %21 : vector<8x256xf32> to vector<1x8x256xf32>
    tpu.vector_store %arg5[%c0_9, %c0_10, %c0_11], %24 {strides = array<i32>} : memref<1x8x256xf32, #tpu.memory_space<vmem>>, vector<1x8x256xf32>,
    return
  }
  func.func @transform_0(%arg0: i32, %arg1: i32) -> (i32, i32, i32, i32) {
    %c0_i32 = arith.constant 0 : i32
    %c0_i32_0 = arith.constant 0 : i32
    %c0_i32_1 = arith.constant 0 : i32
    return %arg0, %arg1, %c0_i32, %c0_i32_0 : i32, i32, i32, i32
  }
  func.func @transform_1(%arg0: i32, %arg1: i32) -> (i32, i32) {
    %c0_i32 = arith.constant 0 : i32
    %c0_i32_0 = arith.constant 0 : i32
    %c0_i32_1 = arith.constant 0 : i32
    return %c0_i32, %c0_i32_0 : i32, i32
  }
  func.func @transform_2(%arg0: i32, %arg1: i32) -> (i32, i32) {
    %c0_i32 = arith.constant 0 : i32
    %c0_i32_0 = arith.constant 0 : i32
    %c0_i32_1 = arith.constant 0 : i32
    return %c0_i32, %c0_i32_0 : i32, i32
  }
  func.func @transform_3(%arg0: i32, %arg1: i32) -> (i32, i32, i32) {
    %c0_i32 = arith.constant 0 : i32
    %c0_i32_0 = arith.constant 0 : i32
    return %arg0, %c0_i32, %arg1 : i32, i32, i32
  }
}

</mosaic_0001>

<bundles_post_ra>
// kernel: tpu_custom_call.1
= control target key start
LH: loop header
LB: loop body
LE: loop exit
PB: predicated region body
PF: predicated region fallthrough
CT: control target
= control target key end

     0   :  { %8 = vsyncpa [#allocation3], 0  ;;  %s1016_s0 = inlined_call_operand.hbm [shape: f32[2,2,8,322], index: 0, kind: input, shape index: {}]   ;;  %s1017_s1 = inlined_call_operand.vmem [shape: f32[8,72], index: 1, kind: input, shape index: {}]   ;;  %s1018_s2 = inlined_call_operand.vmem [shape: f32[8,1], index: 2, kind: input, shape index: {}]   ;;  %s1019_s3 = inlined_call_operand.hbm [shape: f32[2,8,512], index: 3, kind: output, shape index: {}]  }
   0x1   :  { %10 = vsyncpa [#allocation3 + $0x1], 0 }
   0x2   :  { %11 = vsyncpa [#allocation4], 0 }
   0x3   :  { %13 = vsyncpa [#allocation4 + $0x1], 0  ;;  %s815_s12 = smov 0   ;;  %s817_s13 = smov 0  }
   0x4   :  { %s819_s14 = smov 0   ;;  %s821_s15 = smov 0  }
   0x5   :  { %s823_s16 = smov 0   ;;  %s825_s17 = smov 0  }
   0x6   :  { %s827_s18 = smov 0   ;;  %s829_s19 = smov 0  }
   0x7 LB: > { %s494_s20 = sadd.s32 4294967295, %s781_s19   ;;  %s495_s21 = sadd.s32 4294967294, %s781_s19   ;;  %s781_s19 = sphi %s829_s19, %s19_s19   ;;  %s777_s18 = sphi %s827_s18, %s1039_s18   ;;  %s773_s17 = sphi %s825_s17, %s1038_s17   ;;  %s769_s16 = sphi %s823_s16, %s1037_s16   ;;  %s765_s15 = sphi %s821_s15, %s1036_s15   ;;  %s761_s14 = sphi %s819_s14, %s1035_s14   ;;  %s757_s13 = sphi %s817_s13, %s1034_s13   ;;  %s753_s12 = sphi %s815_s12, %s1033_s12  }
   0x8   : > { %s28_s22 = sadd.s32 1, %s773_s17  ;;  %s31_s23 = sadd.s32 1, %s777_s18 }
   0x9   : > { %p29_p0 = scmp.ge.s32.totalorder %s28_s22, 2  ;;  %s40_s24 = sadd.s32 1, %s761_s14 }
   0xa   : > { %p47_p1 = scmp.ne.s32.totalorder %s761_s14, %s757_s13  ;;  %p48_p2 = scmp.eq.s32.totalorder %s781_s19, 0 }
   0xb   : > { %s1041_s22 = smov (%p29_p0, %s28_s22), 0  ;;  %s1043_s23 = smov (!%p29_p0, %s31_s23), %s777_s18 }
   0xc   : > { %s36_s25 = ssub.s32 %s773_s17, %s1041_s22  ;;  %p868_p3 = por %p48_p2, %p47_p1 }
   0xd   : > { %p33_p4 = scmp.ge.s32.totalorder %s1043_s23, 2  ;;  %p53_p5 = scmp.ne.s32.totalorder %s757_s13, %s753_s12 }
   0xe   : > { %p54_p6 = scmp.eq.s32.totalorder %s494_s20, 0  ;;  %p121_p7 = scmp.eq.s32.totalorder %s494_s20, 3 }
   0xf   : > { %s1045_s23 = smov (%p33_p4, %s1043_s23), 0  ;;  %p127_p10 = scmp.eq.s32.totalorder %s495_s21, 3 }
  0x10   : > { %1023 = sst [smem:[#allocation8_spill]] %s1045_s23  ;;  %p876_p8 = por %p54_p6, %p53_p5 }
  0x11   : > { %p880_p9 = por %p121_p7, %p47_p1  ;;  %s35_s29 = ssub.s32 %s777_s18, %s1045_s23 }
  0x12   : > { %s37_s30 = sor.u32 %s36_s25, %s35_s29  ;;  %p886_p12 = por %p127_p10, %p53_p5 }
  0x13   : > { %s1025_s28 = scalar_select %p880_p9, 1, 0 }
  0x14   : > { %p38_p11 = scmp.eq.s32.totalorder %s37_s30, 0  ;;  %p540_p13 = scmp.lt.s32.totalorder %s781_s19, 4 }
  0x15   : > { %s1026_s4 = scalar_select %p886_p12, 1, 0 }
  0x16   : > { %s153_s5 = sand.u32 1, %s761_s14   ;;  %s525_s8 = smul.u32 3, %s773_s17 }
  0x17   : > { %s893_s6 = scalar_select %p38_p11, %s761_s14, %s40_s24  }
  0x18   : > { %s524_s7 = smul.u32 24, %s153_s5  ;;  %p898_p0 = pnand %p540_p13, %p868_p3 }
  0x19   : > { %s526_s10 = smul.u32 6, %s777_s18  ;;  %s154_s26 = scalar_lea.sflag [#allocation3], %s153_s5 }
  0x1a   : > { %s157_s11 = scalar_lea.vmem [#allocation2], %s524_s7  ;;  %p655_p4 = pneg %p898_p0 }
  0x1b   : > { %s167_s20 = sshll.u32 %s157_s11, 4  ;;  %s163_s21 = sadd.s32 %s526_s10, %s525_s8  ;;  %s903_s20 = int_to_ptr.vmem [resolvable:$true] %s167_s20 }
  0x1c   : > { %s498_s25 = sshll.u32 %s163_s21, 7  ;;  %s658_s10 = scalar_lea.hbm %s1016_s0, 1536 }
  0x1d   : > { %s909_s30 = scalar_lea.hbm %s1016_s0, %s498_s25 }
  0x1e   : > { %s653_s23 = scalar_lea.hbm %s909_s30, 384  ;;  %p659_p7 = scmp.lt.u32.totalorder %s909_s30, %s1016_s0 }
  0x1f   : > { %p654_p3 = scmp.ne.s32.totalorder %s909_s30, %s653_s23  ;;  %p660_p10 = scmp.lt.u32.totalorder %s658_s10, %s653_s23 }
  0x20   : > { %p662_p13 = scmp.lt.u32.totalorder %s653_s23, %s909_s30 }
  0x21   : > { %p656_p5 = pnand %p655_p4, %p654_p3  ;;  %p661_p11 = por %p660_p10, %p659_p7 }
  0x23   : > { %p657_p6 = pneg %p656_p5  ;;  %p663_p1 = por %p662_p13, %p661_p11 }
  0x25   : > { %p664_p2 = pnand %p663_p1, %p657_p6 }
  0x27   : > { %667 = shalt.err (!%p664_p2)
}
  0x28   : > { %s668_s5 = scalar_lea.vmem %s903_s20, 384  ;;  %s783_s25 = smov [#allocation2]  }
  0x29   : > { %p669_p3 = scmp.ne.s32.totalorder %s903_s20, %s668_s5  ;;  %s673_s29 = sshll.u32 %s783_s25, 4  ;;  %s674_s29 = int_to_ptr.vmem [resolvable:$false] %s673_s29 }
  0x2a   : > { %s675_s24 = scalar_lea.vmem %s674_s29, 768  ;;  %p676_p9 = scmp.lt.s32.totalorder %s903_s20, %s674_s29 }
  0x2b   : > { %p671_p5 = pnand %p669_p3, %p655_p4  ;;  %p677_p7 = scmp.lt.s32.totalorder %s675_s24, %s668_s5 }
  0x2d   : > { %p672_p12 = pneg %p671_p5  ;;  %p678_p10 = por %p677_p7, %p676_p9 }
  0x2f   : > { %p679_p11 = pnand %p678_p10, %p672_p12 }
  0x31   : > { %682 = shalt.err (!%p679_p11)
}
  0x32   : > { %535 = dma.hbm_to_vmem [thread:$0]  (!%p898_p0), %s909_s30, 384, %s903_s20, %s154_s26  }
  0x33   : > { %p1028_p1 = scmp.lt.s32.totalorder %s781_s19, 5  ;;  %p1029_p2 = scmp.ge.s32.totalorder %s781_s19, 1 }
  0x35   : > { %p173_p4 = pnand %p1029_p2, %p1028_p1 }
  0x36   : > { %s942_s23 = sand.u32 (!%p173_p4), 1, %s757_s13  }
  0x37   : > { %176 = sbr.rel (%p173_p4) target bundleno = 447 (0x1bf), region = 32  ;;  %s179_s8 = scalar_lea.sflag (!%p173_p4), [#allocation3], %s942_s23 }
  0x38   : > { %s527_s7 = smul.u32 (!%p173_p4), 24, %s942_s23 }
  0x3a   : > { %s182_s10 = scalar_lea.vmem (!%p173_p4), [#allocation2], %s527_s7 }
  0x3e   : > { %744 = dma.done.wait (%p876_p8), %s179_s8, 384  }
  0x3f   : > { %746 = vsyncadd (%p876_p8), %s179_s8, 4294966912  ;;  %v207_v0 = vld [vmem:[%s182_s10 + $0x8] sm:$0xff]  ;;  %v208_v1 = vld [vmem:[%s182_s10 + $0x10] sm:$0xff]  ;;  %s784_s9 = smov 126   ;;  %s785_s20 = smov 127   ;;  %v791_v4 = vmov 0.0  }
  0x40   : > { %v621_v2 = vpack.i.bf16 %v208_v1, %v207_v0  ;;  %v206_v3 = vld [vmem:[%s182_s10] sm:$0xff]  ;;  %s786_s30 = smov 96   ;;  %s787_s26 = smov 94   ;;  %375 = vmatprep.mubr.f32.mxu0 %v791_v4  ;;  %v792_v5 = vmov 0   ;;  %vm218_vm0 = vcmask 1039360   ;;  %vm240_vm1 = vcmask 785408  }
  0x41   : > { %s788_s11 = smov 95   ;;  %s789_s27 = smov 63   ;;  %651 = vset.pattern.permute.xlu1 %v792_v5  ;;  %652 = vset.pattern.permute.xlu0 %v792_v5  ;;  %v301_v6 = vld [vmem:[%s1018_s2] sm:$0xff]  ;;  %vm229_vm2 = vcmask 1031168   ;;  %vm262_vm3 = vcmask 769024   ;;  %vm251_vm4 = vcmask 777216  }
  0x42   : > { %622 = vrot.lane.b32.xlu1 %v621_v2, %s784_s9  ;;  %617 = vrot.lane.b32.xlu0 %v621_v2, %s785_s20  ;;  %s790_s21 = smov 64   ;;  %s793_s5 = smov 62   ;;  %vm284_vm5 = vcmask 515072   ;;  %vm273_vm6 = vcmask 523264   ;;  %vm295_vm7 = vcmask 506880   ;;  %v300_v61 = vld [vmem:[%s1017_s1] sm:$0xff] }
  0x43   : > { %vm307_vm8 = vcmask 588800   ;;  %s500_s8 = sshll.u32 %s942_s23, 4  ;;  %s503_s10 = sshll.u32 %s765_s15, 1 }
  0x44   : > { %p1030_p9 = scmp.ne.s32.totalorder %s1025_s28, 0  ;;  %s794_s25 = smov [#allocation5]  }
  0x45   : > { %s687_s29 = sshll.u32 %s794_s25, 4  ;;  %s688_s29 = int_to_ptr.vmem [resolvable:$false] %s687_s29 }
  0x46   : > { %627 = vrot.lane.b32.xlu1 %v621_v2, %s786_s30  ;;  %212 = vrot.lane.b32.xlu0 %v206_v3, %s785_s20  ;;  %s689_s24 = scalar_lea.vmem %s688_s29, 512 }
  0x4a   : > { %234 = vrot.lane.b32.xlu1 %v206_v3, %s786_s30  ;;  %223 = vrot.lane.b32.xlu0 %v206_v3, %s784_s9  ;;  %s504_s9 = sshll.u32 %s769_s16, 2  ;;  %s391_s16 = scalar_lea.sflag [#allocation4], %s942_s23 }
  0x4b   : > { %s403_s20 = sadd.s32 %s504_s9, %s503_s10 }
  0x4c   : > { %s505_s30 = sshll.u32 %s403_s20, 7 }
  0x4d   : > { %s962_s15 = scalar_lea.hbm %s1019_s3, %s505_s30 }
  0x4e   : > { %637 = vrot.lane.b32.xlu1 %v621_v2, %s787_s26  ;;  %632 = vrot.lane.b32.xlu0 %v621_v2, %s788_s11 }
  0x52   : > { %256 = vrot.lane.b32.xlu1 %v206_v3, %s787_s26  ;;  %245 = vrot.lane.b32.xlu0 %v206_v3, %s788_s11  ;;  %s204_s26 = scalar_lea.vmem [#allocation5], %s500_s8 }
  0x53   : > { %s407_s11 = sshll.u32 %s204_s26, 4  ;;  %s964_s11 = int_to_ptr.vmem [resolvable:$true] %s407_s11 }
  0x54   : > { %p690_p6 = scmp.lt.s32.totalorder %s964_s11, %s688_s29 }
  0x56   : > { %647 = vrot.lane.b32.xlu1 %v621_v2, %s789_s27  ;;  %642 = vrot.lane.b32.xlu0 %v621_v2, %s790_s21 }
  0x5a   : > { %278 = vrot.lane.b32.xlu1 %v206_v3, %s789_s27  ;;  %267 = vrot.lane.b32.xlu0 %v206_v3, %s790_s21 }
  0x5e   : > { %293 = vrot.lane.b32.xlu1 %v208_v1, %s793_s5  ;;  %291 = vrot.lane.b32.xlu0 %v207_v0, %s793_s5 }
  0x62   : > { %289 = vrot.lane.b32.xlu0 %v206_v3, %s793_s5  ;;  %304 = vperm.xlu1 %651, %v301_v6   ;;  %s683_s5 = scalar_lea.vmem %s964_s11, 256 }
  0x63   : > { %p684_p8 = scmp.ne.s32.totalorder %s964_s11, %s683_s5  ;;  %p691_p13 = scmp.lt.s32.totalorder %s689_s24, %s683_s5 }
  0x65   : > { %p685_p12 = pnand %p684_p8, %p1030_p9  ;;  %p692_p3 = por %p691_p13, %p690_p6 }
  0x67   : > { %p686_p0 = pneg %p685_p12 }
  0x69   : > { %p693_p5 = pnand %p692_p3, %p686_p0 }
  0xb4   : > { %v623_v7 = vpop.permute.xlu1 %622  ;;  %v618_v8 = vpop.permute.xlu0 %617 }
  0xb5   : > { %v620_v9 = vunpack.i.h.bf16 %v618_v8  ;;  %v619_v10 = vunpack.i.l.bf16 %v618_v8  ;;  %v625_v11 = vunpack.i.h.bf16 %v623_v7  ;;  %v624_v12 = vunpack.i.l.bf16 %v623_v7 }
  0xb7   : > { %v220_v13 = vsel %vm218_vm0, %v619_v10, %v620_v9  ;;  %v231_v21 = vsel %vm229_vm2, %v624_v12, %v625_v11 }
  0xb8   : > { %v628_v14 = vpop.permute.xlu1 %627  ;;  %v213_v15 = vpop.permute.xlu0 %212  ;;  %v508_v16 = vpack.c.bf16 %v220_v13, %v207_v0 }
  0xb9   : > { %v630_v17 = vunpack.i.h.bf16 %v628_v14  ;;  %v629_v18 = vunpack.i.l.bf16 %v628_v14  ;;  %v219_v19 = vsel %vm218_vm0, %v213_v15, %v619_v10 }
  0xba   : > { %509 = vmatprep.subr.bf16.mxu0 %v508_v16  ;;  %v510_v20 = vpack.c.bf16 %v219_v19, %v206_v3 }
  0xbb   : > { %v242_v22 = vsel %vm240_vm1, %v629_v18, %v630_v17 }
  0xbc   : > { %v235_v23 = vpop.permute.xlu1 %234  ;;  %511 = vmatpush1.bf16.msra.mxu0 %v510_v20  ;;  %v224_v24 = vpop.permute.xlu0 %223  ;;  %v512_v25 = vpack.c.bf16 %v242_v22, %v231_v21 }
  0xbd   : > { %v241_v26 = vsel %vm240_vm1, %v235_v23, %v629_v18  ;;  %v230_v27 = vsel %vm229_vm2, %v224_v24, %v624_v12 }
  0xbe   : > { %v514_v28 = vpack.c.bf16 %v241_v26, %v230_v27  ;;  %513 = vmatprep.subr.bf16.mxu0 %v512_v25 }
  0xc0   : > { %v638_v29 = vpop.permute.xlu1 %637  ;;  %515 = vmatpush1.bf16.msra.mxu0 %v514_v28  ;;  %v633_v30 = vpop.permute.xlu0 %632 }
  0xc1   : > { %v640_v31 = vunpack.i.h.bf16 %v638_v29  ;;  %v639_v32 = vunpack.i.l.bf16 %v638_v29  ;;  %v635_v33 = vunpack.i.h.bf16 %v633_v30  ;;  %v634_v34 = vunpack.i.l.bf16 %v633_v30 }
  0xc3   : > { %v253_v35 = vsel %vm251_vm4, %v634_v34, %v635_v33  ;;  %v264_v36 = vsel %vm262_vm3, %v639_v32, %v640_v31 }
  0xc4   : > { %v257_v37 = vpop.permute.xlu1 %256  ;;  %v246_v38 = vpop.permute.xlu0 %245  ;;  %v516_v39 = vpack.c.bf16 %v264_v36, %v253_v35 }
  0xc5   : > { %v263_v40 = vsel %vm262_vm3, %v257_v37, %v639_v32  ;;  %v252_v41 = vsel %vm251_vm4, %v246_v38, %v634_v34 }
  0xc6   : > { %v518_v42 = vpack.c.bf16 %v263_v40, %v252_v41  ;;  %517 = vmatprep.subr.bf16.mxu0 %v516_v39 }
  0xc8   : > { %v648_v43 = vpop.permute.xlu1 %647  ;;  %v643_v44 = vpop.permute.xlu0 %642  ;;  %519 = vmatpush1.bf16.msra.mxu0 %v518_v42 }
  0xc9   : > { %v650_v45 = vunpack.i.h.bf16 %v648_v43  ;;  %v649_v46 = vunpack.i.l.bf16 %v648_v43  ;;  %v645_v47 = vunpack.i.h.bf16 %v643_v44  ;;  %v644_v48 = vunpack.i.l.bf16 %v643_v44 }
  0xcb   : > { %v275_v49 = vsel %vm273_vm6, %v644_v48, %v645_v47  ;;  %v286_v50 = vsel %vm284_vm5, %v649_v46, %v650_v45 }
  0xcc   : > { %v279_v51 = vpop.permute.xlu1 %278  ;;  %v268_v52 = vpop.permute.xlu0 %267  ;;  %v520_v53 = vpack.c.bf16 %v286_v50, %v275_v49 }
  0xcd   : > { %v285_v54 = vsel %vm284_vm5, %v279_v51, %v649_v46  ;;  %v274_v55 = vsel %vm273_vm6, %v268_v52, %v644_v48 }
  0xce   : > { %v522_v56 = vpack.c.bf16 %v285_v54, %v274_v55  ;;  %521 = vmatprep.subr.bf16.mxu0 %v520_v53 }
  0xd0   : > { %v294_v57 = vpop.permute.xlu1 %293  ;;  %v292_v58 = vpop.permute.xlu0 %291  ;;  %523 = vmatpush1.bf16.msra.mxu0 %v522_v56 }
  0xd1   : > { %v297_v59 = vsel %vm295_vm7, %v292_v58, %v294_v57 }
  0xd2   : > { %327 = vmatprep.subr.mxu0 %v297_v59 }
  0xd4   : > { %v290_v60 = vpop.permute.xlu0 %289 }
  0xd5   : > { %v296_v62 = vsel %vm295_vm7, %v290_v60, %v292_v58 }
  0xd6   : > { %328 = vmatpush1.msra.mxu0 %v296_v62 }
  0xd7   : > { %501 = vmatmul.mubr.msk.f32.vlgmr.msra.gmra.mrb[0].mxu0 %vm307_vm8, %v300_v61 }
  0xe1   : > { %v305_v63 = vpop.permute.xlu1 %304 }
 0x1aa   : > { %v377_v0 = vpop.f32.mrb[0].mxu0 }
 0x1ab   : > { %v378_v1 = vadd.f32 %v377_v0, %v305_v63  ;;  %v379_v2 = vpop.f32.mrb[1].mxu0 }
 0x1ac   : > { %v380_v3 = vadd.f32 %v379_v2, %v305_v63 }
 0x1ad   : > { %vm382_vm9 = vcmp.gt.f32.partialorder %v378_v1, 0.0  ;;  %v384_v4 = vmul.f32 0.1, %v378_v1 }
 0x1ae   : > { %vm383_vm10 = vcmp.gt.f32.partialorder %v380_v3, 0.0  ;;  %v385_v5 = vmul.f32 0.1, %v380_v3 }
 0x1af   : > { %v386_v6 = vsel %vm382_vm9, %v378_v1, %v384_v4 }
 0x1b0   : > { %388 = vst [vmem:[%s204_s26] sm:$0xff] %v386_v6  ;;  %v387_v7 = vsel %vm383_vm10, %v380_v3, %v385_v5 }
 0x1b1   : > { %389 = vst [vmem:[%s204_s26 + $0x8] sm:$0xff] %v387_v7 }
 0x1b2   : > { %696 = shalt.err (!%p693_p5)
}
 0x1b3   : > { %s697_s23 = scalar_lea.hbm %s962_s15, 256  ;;  %s701_s10 = scalar_lea.hbm %s1019_s3, 1024 }
 0x1b4   : > { %p698_p7 = scmp.ne.s32.totalorder %s962_s15, %s697_s23  ;;  %p702_p1 = scmp.lt.u32.totalorder %s962_s15, %s1019_s3 }
 0x1b5   : > { %p703_p2 = scmp.lt.u32.totalorder %s701_s10, %s697_s23  ;;  %p705_p8 = scmp.lt.u32.totalorder %s697_s23, %s962_s15 }
 0x1b6   : > { %p699_p10 = pnand %p698_p7, %p1030_p9 }
 0x1b7   : > { %p704_p4 = por %p703_p2, %p702_p1 }
 0x1b8   : > { %p700_p11 = pneg %p699_p10 }
 0x1b9   : > { %p706_p12 = por %p705_p8, %p704_p4 }
 0x1bb   : > { %p707_p0 = pnand %p706_p12, %p700_p11 }
 0x1bd   : > { %710 = shalt.err (!%p707_p0)
}
 0x1be   : > { %530 = dma.vmem_to_hbm [thread:$0]  (%p1030_p9), %s964_s11, 256, %s962_s15, %s391_s16  }
 0x1bf PF: > { %p541_p6 = scmp.ge.s32.totalorder %s781_s19, 2  ;;  %s419_s30 = sand.u32 1, %s753_s12  }
 0x1c0   : > { %p1031_p13 = scmp.ne.s32.totalorder %s1026_s4, 0  ;;  %s420_s26 = scalar_lea.sflag [#allocation4], %s419_s30 }
 0x1c2   : > { %p537_p3 = pnand %p541_p6, %p1031_p13 }
 0x1c4   : > { %748 = dma.done.wait (!%p537_p3), %s420_s26, 256  }
 0x1c5   : > { %750 = vsyncadd (!%p537_p3), %s420_s26, 4294967040  ;;  %s19_s19 = sadd.s32 1, %s781_s19   ;;  %s1032_s28 = sld [smem:[#allocation8_spill]] }
 0x1c6   : > { %p16_p5 = scmp.ge.s32.totalorder %s19_s19, 6   ;;  %s1033_s12 = smov %s757_s13 }
 0x1c7   : > { %s1034_s13 = smov %s761_s14  ;;  %s1035_s14 = smov %s893_s6 }
 0x1c8   : > { %s1036_s15 = smov %s773_s17  ;;  %s1037_s16 = smov %s777_s18 }
 0x1c9   : > { %s1038_s17 = smov %s1041_s22  ;;  %18 = sbr.rel (!%p16_p5) target bundleno = 7 (0x7), region = 77 }
 0x1cb   : > { %s1039_s18 = smov %s1032_s28 }
 0x1d0   :  { %425 = vsyncpa [#allocation3], 1 }
 0x1d1   :  { %427 = vsyncpa [#allocation3 + $0x1], 1 }
 0x1d2   :  { %428 = vsyncpa [#allocation4], 1 }
 0x1d3   :  { %430 = vsyncpa [#allocation4 + $0x1], 1 }

</bundles_post_ra>
